<compile_context>
chip_gen: v7x
topology: tpu7x:2x2x1
jax: 0.10.0
libtpu: 0.0.40
codegen_flags: <defaults>
</compile_context>

<pallas_src>
import jax
import jax.numpy as jnp
from jax.experimental import pallas as pl
from jax.experimental.pallas import tpu as pltpu

_LANES = 128
_SMALL_BYTES = 256 * 1024               # <= 256 KiB -> single grid point
_TARGET_BLOCK_BYTES = 2 * 1024 * 1024   # ~2 MiB blocks -> 8 MiB pipelined working set


def _copy_kernel(x_ref, o_ref):
    # Identity: copy the VMEM tile straight through.
    o_ref[...] = x_ref[...]


def _sublane_granule(dtype):
    # 32-bit -> 8 sublanes, bf16/f16 -> 16, int8/fp8 -> 32 (sub-32-bit dtypes
    # pack along sublanes; full granules keep every vld/vst full-width).
    itemsize = jnp.dtype(dtype).itemsize
    return max(8, 32 // max(1, itemsize))


def shortcut(x):
    """Forward of the ShortCut module (identity), run through a Pallas kernel."""
    orig_shape = x.shape
    total = int(x.size)
    if total == 0:
        return x

    itemsize = jnp.dtype(x.dtype).itemsize
    sublane = _sublane_granule(x.dtype)

    # Fast path: numel already a multiple of the lane width -> reshape is free
    # metadata, no pad / no tail slice, exactly 2N bytes of HBM traffic.
    lane_aligned = (total % _LANES == 0)
    if lane_aligned:
        rows = total // _LANES
        slab = x.reshape(rows, _LANES)
    else:
        # Ragged tail: pad only up to a dtype-aware sublane granule of rows.
        rows = -(-total // _LANES)
        rows = -(-rows // sublane) * sublane
        flat = jnp.pad(x.reshape(-1), (0, rows * _LANES - total))
        slab = flat.reshape(rows, _LANES)

    total_bytes = rows * _LANES * itemsize
    cost = pl.CostEstimate(flops=0, transcendentals=0,
                           bytes_accessed=2 * total_bytes)

    if total_bytes <= _SMALL_BYTES:
        # Tiny tensor: whole slab resident in VMEM, one invocation.
        # NOTE: callers that donate the input can add input_output_aliases={0: 0}
        # to make the identity ~O(1) in HBM traffic; left off here so a
        # non-donated input does not force XLA to insert a defensive copy.
        out = pl.pallas_call(
            _copy_kernel,
            out_shape=jax.ShapeDtypeStruct((rows, _LANES), slab.dtype),
            in_specs=[pl.BlockSpec(memory_space=pltpu.MemorySpace.VMEM)],
            out_specs=pl.BlockSpec(memory_space=pltpu.MemorySpace.VMEM),
            cost_estimate=cost,
        )(slab)
    else:
        # Byte-budgeted, dtype-aware block rows (always a sublane multiple, so
        # the (8,128) block-shape rule holds; the array itself need not divide
        # evenly — Pallas clips the partial last block).
        budget_rows = max(
            sublane,
            (_TARGET_BLOCK_BYTES // (_LANES * itemsize)) // sublane * sublane)
        n_blocks = max(2, pl.cdiv(rows, budget_rows))
        if n_blocks % 2:
            n_blocks += 1                      # even split keeps both v7x cores busy
        ceil_rows = -(-rows // n_blocks)
        block_rows = max(sublane, -(-ceil_rows // sublane) * sublane)
        grid = (pl.cdiv(rows, block_rows),)

        out = pl.pallas_call(
            _copy_kernel,
            out_shape=jax.ShapeDtypeStruct((rows, _LANES), slab.dtype),
            grid=grid,
            in_specs=[pl.BlockSpec((block_rows, _LANES), lambda i: (i, 0))],
            out_specs=pl.BlockSpec((block_rows, _LANES), lambda i: (i, 0)),
            compiler_params=pltpu.CompilerParams(
                dimension_semantics=("parallel",)),
            cost_estimate=cost,
        )(slab)

    if lane_aligned:
        return out.reshape(orig_shape)
    return out.reshape(-1)[:total].reshape(orig_shape)


if __name__ == "__main__":
    key = jax.random.PRNGKey(0)
    N, C, H, W = 2, 4, 16, 16
    x = jax.random.normal(key, (N, C, H, W), jnp.float32)

    out = shortcut(x)
    out = jax.block_until_ready(out)

    # Reference: the module is identity.
    assert out.shape == x.shape and out.dtype == x.dtype
    if not bool(jnp.array_equal(out, x)):
        err = float(jnp.max(jnp.abs(out - x)))
        raise SystemExit(f"mismatch vs identity reference, max abs err = {err}")
    print("KERNEL_OK")
</pallas_src>

<mosaic_0001>
module attributes {stable_mosaic.version = 11 : i64} {
  func.func @_copy_kernel(%arg0: memref<16x128xf32, #tpu.memory_space<vmem>>, %arg1: memref<16x128xf32, #tpu.memory_space<vmem>>) attributes {dimension_semantics = [], scalar_prefetch = 0 : i64, scratch_operands = 0 : i64, tpu.core_type = #tpu.core_type<tc>} {
    %c0 = arith.constant 0 : index
    %c0_0 = arith.constant 0 : index
    %0 = vector.load %arg0[%c0, %c0_0] : memref<16x128xf32, #tpu.memory_space<vmem>>, vector<16x128xf32>
    %c0_1 = arith.constant 0 : index
    %c0_2 = arith.constant 0 : index
    %1 = vector.load %arg1[%c0_1, %c0_2] : memref<16x128xf32, #tpu.memory_space<vmem>>, vector<16x128xf32>
    tpu.vector_store %arg1[%c0_1, %c0_2], %0 {strides = array<i32>} : memref<16x128xf32, #tpu.memory_space<vmem>>, vector<16x128xf32>,
    return
  }
}

</mosaic_0001>

<bundles_post_ra>
// kernel: tpu_custom_call.1
= control target key start
LH: loop header
LB: loop body
LE: loop exit
PB: predicated region body
PF: predicated region fallthrough
CT: control target
= control target key end

     0   :  { %6 = vsyncpa [#allocation3], 0  ;;  %s134_s0 = inlined_call_operand.hbm [shape: f32[16,128], index: 0, kind: input, shape index: {}]   ;;  %s135_s1 = inlined_call_operand.hbm [shape: f32[16,128], index: 1, kind: output, shape index: {}]  }
   0x1   :  { %7 = vsyncpa [#allocation4], 0  ;;  %s96_s6 = smov [#allocation2]   ;;  %s48_s10 = scalar_lea.hbm %s134_s0, 256 }
   0x2   :  { %s13_s7 = sshll.u32 %s96_s6, 4  ;;  %p49_p0 = scmp.ne.s32.totalorder %s134_s0, %s48_s10  ;;  %s14_s7 = int_to_ptr.vmem [resolvable:$true] %s13_s7 }
   0x3   :  { %p52_p1 = scmp.lt.u32.totalorder %s48_s10, %s134_s0 }
   0x5   :  { %p54_p2 = pnand %p52_p1, %p49_p0 }
   0x7   :  { %57 = shalt.err (!%p54_p2)
}
   0x8   :  { %s58_s15 = scalar_lea.vmem %s14_s7, 256  ;;  %p63_p4 = scmp.lt.s32.totalorder %s14_s7, %s14_s7 }
   0x9   :  { %p59_p3 = scmp.ne.s32.totalorder %s14_s7, %s58_s15  ;;  %p64_p5 = scmp.lt.s32.totalorder %s58_s15, %s58_s15 }
   0xb   :  { %p65_p6 = por %p64_p5, %p63_p4 }
   0xd   :  { %p66_p7 = pnand %p65_p6, %p59_p3 }
   0xf   :  { %69 = shalt.err (!%p66_p7)
}
  0x10   :  { %s97_s16 = smov 128   ;;  %s98_s17 = smov 8  }
  0x11   :  { %19 = dma.hbm_to_vmem [thread:$0]  %s134_s0, 256, %s14_s7, [#allocation3], %s97_s16, %s97_s16, %s98_s17  }
  0x12   :  { %92 = dma.done.wait [#allocation3], 256  }
  0x13   :  { %93 = vsyncadd [#allocation3], 4294967040  ;;  %s99_s20 = smov [#allocation5]   ;;  %v23_v0 = vld [vmem:[#allocation2] sm:$0xff]  ;;  %v24_v1 = vld [vmem:[#allocation2 + $0x8] sm:$0xff] }
  0x14   :  { %s32_s21 = sshll.u32 %s99_s20, 4  ;;  %25 = vst [vmem:[#allocation5] sm:$0xff] %v23_v0  ;;  %26 = vst [vmem:[#allocation5 + $0x8] sm:$0xff] %v24_v1  ;;  %s33_s21 = int_to_ptr.vmem [resolvable:$true] %s32_s21 }
  0x15   :  { %s70_s22 = scalar_lea.vmem %s33_s21, 256  ;;  %p75_p9 = scmp.lt.s32.totalorder %s33_s21, %s33_s21 }
  0x16   :  { %p71_p8 = scmp.ne.s32.totalorder %s33_s21, %s70_s22  ;;  %p76_p10 = scmp.lt.s32.totalorder %s70_s22, %s70_s22 }
  0x18   :  { %p77_p11 = por %p76_p10, %p75_p9 }
  0x1a   :  { %p78_p12 = pnand %p77_p11, %p71_p8 }
  0x1c   :  { %81 = shalt.err (!%p78_p12)
}
  0x1d   :  { %s82_s0 = scalar_lea.hbm %s135_s1, 256 }
  0x1e   :  { %p83_p13 = scmp.ne.s32.totalorder %s135_s1, %s82_s0  ;;  %p86_p0 = scmp.lt.u32.totalorder %s82_s0, %s135_s1 }
  0x20   :  { %p88_p1 = pnand %p86_p0, %p83_p13 }
  0x22   :  { %91 = shalt.err (!%p88_p1)
}
  0x23   :  { %38 = dma.vmem_to_hbm [thread:$0]  %s33_s21, 256, %s135_s1, [#allocation4], %s97_s16, %s97_s16, %s98_s17  }
  0x24   :  { %94 = dma.done.wait [#allocation4], 256  }
  0x25   :  { %95 = vsyncadd [#allocation4], 4294967040 }
  0x26   :  { %42 = vsyncpa [#allocation3], 1 }
  0x27   :  { %43 = vsyncpa [#allocation4], 1 }

</bundles_post_ra>
